<compile_context>
chip_gen: v7x
topology: tpu7x:2x2x1
jax: 0.10.0
libtpu: 0.0.40
codegen_flags: <defaults>
</compile_context>

<pallas_src>
import functools

import jax
import jax.numpy as jnp
import numpy as np
from jax.experimental import pallas as pl
from jax.experimental.pallas import tpu as pltpu


def _channel_pad_kernel(x_ref, o_ref, *, pad_c):
    """x_ref: (BN, C, HW)  ->  o_ref: (BN, C + 2*pad_c, HW), zero channel pad."""
    x = x_ref[...].astype(o_ref.dtype)
    if pad_c == 0:
        o_ref[...] = x
    else:
        bn, _, hw = x.shape
        z = jnp.zeros((bn, pad_c, hw), dtype=o_ref.dtype)
        # Build the whole padded tile in registers and store it exactly once.
        o_ref[...] = jnp.concatenate([z, x, z], axis=1)


def _pick_batch_block(n, bytes_per_image, vmem_budget_bytes=8 * 1024 * 1024):
    """Largest divisor of n whose double-buffered in+out footprint fits the
    budget, while keeping at least 2 grid steps when n >= 2 (megacore /
    v7x dual-TensorCore utilization)."""
    max_by_mem = max(1, vmem_budget_bytes // max(1, 2 * bytes_per_image))
    cap = max(1, n // 2) if n >= 2 else n
    target = max(1, min(n, max_by_mem, cap))
    for bn in range(target, 0, -1):
        if n % bn == 0:
            return bn
    return 1


def lambda_layer_forward(x_nchw, planes):
    """Pallas implementation of the ResNet option-A shortcut LambdaLayer.

    x_nchw : (N, C, H, W) array (PyTorch NCHW convention).
    planes : target number of planes of the residual block (pad = planes // 4
             zero channels on each side, matching the PyTorch lambda).
    Returns (N, C + 2*(planes//4), ceil(H/2), ceil(W/2)) in NCHW.
    """
    N, C, H, W = x_nchw.shape
    pad_c = planes // 4
    C_out = C + 2 * pad_c
    H_out = -(-H // 2)   # ::2 slicing => ceil(H/2)
    W_out = -(-W // 2)
    HW = H_out * W_out

    # Stride-2 subsample done by XLA so the kernel only reads what it uses;
    # the following reshape of the (contiguous) slice result is free metadata.
    x_sub = x_nchw[:, :, ::2, ::2].reshape(N, C, HW)

    itemsize = jnp.dtype(x_nchw.dtype).itemsize
    bytes_per_image = (C + C_out) * HW * itemsize
    BN = _pick_batch_block(N, bytes_per_image)

    out_flat = pl.pallas_call(
        functools.partial(_channel_pad_kernel, pad_c=pad_c),
        grid=(N // BN,),
        in_specs=[pl.BlockSpec((BN, C, HW), lambda i: (i, 0, 0))],
        out_specs=pl.BlockSpec((BN, C_out, HW), lambda i: (i, 0, 0)),
        out_shape=jax.ShapeDtypeStruct((N, C_out, HW), x_nchw.dtype),
        compiler_params=pltpu.CompilerParams(dimension_semantics=("parallel",)),
    )(x_sub)

    # Free reshape back to NCHW.
    return out_flat.reshape(N, C_out, H_out, W_out)


def _reference_lambda(x_nchw, planes):
    """Pure-JAX reference of the PyTorch lambda (for verification)."""
    pad_c = planes // 4
    y = x_nchw[:, :, ::2, ::2]
    return jnp.pad(y, ((0, 0), (pad_c, pad_c), (0, 0), (0, 0)))


if __name__ == "__main__":
    # Small shapes consistent with the ResNet shortcut:
    # N=2, C_in=4, H=W=16, downsampling to planes=8 (pad 2 channels each side).
    key = jax.random.PRNGKey(0)
    N, C, H, W = 2, 4, 16, 16
    planes = 2 * C  # LambdaLayer has no parameters; `planes` is the only config.

    x = jax.random.normal(key, (N, C, H, W), dtype=jnp.float32)

    out = jax.block_until_ready(lambda_layer_forward(x, planes))

    ref = _reference_lambda(x, planes)
    assert out.shape == ref.shape, (out.shape, ref.shape)
    np.testing.assert_allclose(np.asarray(out), np.asarray(ref), rtol=0, atol=0)

    print("KERNEL_OK")
</pallas_src>

<mosaic_0001>
module attributes {stable_mosaic.version = 11 : i64} {
  func.func @_channel_pad_kernel(%arg0: i32, %arg1: memref<1x4x64xf32, #tpu.memory_space<vmem>>, %arg2: memref<1x8x64xf32, #tpu.memory_space<vmem>>) attributes {dimension_semantics = [#tpu.dimension_semantics<parallel>], iteration_bounds = array<i64: 2>, scalar_prefetch = 0 : i64, scratch_operands = 0 : i64, tpu.core_type = #tpu.core_type<tc>, window_params = [{transform_indices = @transform_0, window_bounds = array<i64: 1, 4, 64>}, {transform_indices = @transform_1, window_bounds = array<i64: 1, 8, 64>}]} {
    %c0 = arith.constant 0 : index
    %c0_0 = arith.constant 0 : index
    %c0_1 = arith.constant 0 : index
    %0 = vector.load %arg1[%c0, %c0_0, %c0_1] : memref<1x4x64xf32, #tpu.memory_space<vmem>>, vector<1x4x64xf32>
    %cst = arith.constant 0.000000e+00 : f32
    %1 = vector.broadcast %cst : f32 to vector<1x2x64xf32>
    %2 = tpu.concatenate %1, %0, %1 in 1 : vector<1x2x64xf32>, vector<1x4x64xf32>, vector<1x2x64xf32> -> vector<1x8x64xf32>
    %c0_2 = arith.constant 0 : index
    %c0_3 = arith.constant 0 : index
    %c0_4 = arith.constant 0 : index
    %3 = vector.load %arg2[%c0_2, %c0_3, %c0_4] : memref<1x8x64xf32, #tpu.memory_space<vmem>>, vector<1x8x64xf32>
    tpu.vector_store %arg2[%c0_2, %c0_3, %c0_4], %2 {strides = array<i32>} : memref<1x8x64xf32, #tpu.memory_space<vmem>>, vector<1x8x64xf32>,
    return
  }
  func.func @transform_0(%arg0: i32) -> (i32, i32, i32) {
    %c0_i32 = arith.constant 0 : i32
    %c0_i32_0 = arith.constant 0 : i32
    %c0_i32_1 = arith.constant 0 : i32
    return %arg0, %c0_i32, %c0_i32_0 : i32, i32, i32
  }
  func.func @transform_1(%arg0: i32) -> (i32, i32, i32) {
    %c0_i32 = arith.constant 0 : i32
    %c0_i32_0 = arith.constant 0 : i32
    %c0_i32_1 = arith.constant 0 : i32
    return %arg0, %c0_i32, %c0_i32_0 : i32, i32, i32
  }
}

</mosaic_0001>

<bundles_post_ra>
// kernel: tpu_custom_call.1
= control target key start
LH: loop header
LB: loop body
LE: loop exit
PB: predicated region body
PF: predicated region fallthrough
CT: control target
= control target key end

     0   :  { %6 = vsyncpa [#allocation3], 0  ;;  %s556_s0 = inlined_call_operand.hbm [shape: f32[2,4,64], index: 0, kind: input, shape index: {}]   ;;  %s557_s1 = inlined_call_operand.hbm [shape: f32[2,8,64], index: 1, kind: output, shape index: {}]  }
   0x1   :  { %8 = vsyncpa [#allocation3 + $0x1], 0 }
   0x2   :  { %9 = vsyncpa [#allocation4], 0 }
   0x3   :  { %11 = vsyncpa [#allocation4 + $0x1], 0  ;;  %s394_s6 = smov 0   ;;  %s396_s7 = smov 0  }
   0x4   :  { %s398_s8 = smov 0   ;;  %s400_s9 = smov 0  }
   0x5 LB: > { %s415_s10 = sadd.s32 4294967295, %s380_s9   ;;  %s226_s11 = sadd.s32 4294967294, %s380_s9   ;;  %s380_s9 = sphi %s400_s9, %s572_s9   ;;  %s376_s8 = sphi %s398_s8, %s571_s8   ;;  %s372_s7 = sphi %s396_s7, %s570_s7   ;;  %s368_s6 = sphi %s394_s6, %s569_s6  }
   0x6   : > { %s419_s12 = sadd.s32 1, %s380_s9   ;;  %s24_s13 = sadd.s32 1, %s376_s8 }
   0x7   : > { %s21_s14 = ssub.s32 %s380_s9, %s419_s12  ;;  %p31_p0 = scmp.ne.s32.totalorder %s376_s8, %s372_s7 }
   0x8   : > { %p22_p1 = scmp.eq.s32.totalorder %s21_s14, 0  ;;  %p32_p2 = scmp.eq.s32.totalorder %s380_s9, 0 }
   0x9   : > { %p37_p3 = scmp.ne.s32.totalorder %s372_s7, %s368_s6  ;;  %p38_p4 = scmp.eq.s32.totalorder %s415_s10, 0 }
   0xa   : > { %s431_s15 = scalar_select %p22_p1, %s376_s8, %s24_s13  }
   0xb   : > { %p433_p5 = por %p32_p2, %p31_p0  ;;  %p437_p6 = por %p38_p4, %p37_p3 }
   0xc   : > { %p61_p7 = scmp.eq.s32.totalorder %s415_s10, 1  ;;  %p67_p8 = scmp.eq.s32.totalorder %s226_s11, 1 }
   0xd   : > { %p250_p10 = scmp.lt.s32.totalorder %s380_s9, 2  ;;  %s87_s20 = sand.u32 1, %s376_s8  }
   0xe   : > { %p444_p11 = por %p61_p7, %p31_p0  ;;  %p448_p12 = por %p67_p8, %p37_p3 }
   0xf   : > { %s230_s21 = sshll.u32 %s380_s9, 6  ;;  %s229_s22 = sshll.u32 %s87_s20, 2 }
  0x10   : > { %s561_s18 = scalar_select %p444_p11, 1, 0 }
  0x11   : > { %s562_s19 = scalar_select %p448_p12, 1, 0 }
  0x12   : > { %s457_s25 = scalar_lea.hbm %s556_s0, %s230_s21  ;;  %s91_s26 = scalar_lea.vmem [#allocation2], %s229_s22 }
  0x13   : > { %s98_s27 = sshll.u32 %s91_s26, 4  ;;  %p461_p13 = pnand %p250_p10, %p433_p5  ;;  %s465_s27 = int_to_ptr.vmem [resolvable:$true] %s98_s27 }
  0x14   : > { %s88_s29 = scalar_lea.sflag [#allocation3], %s87_s20  ;;  %s284_s30 = scalar_lea.hbm %s457_s25, 64 }
  0x15   : > { %p285_p2 = scmp.ne.s32.totalorder %s457_s25, %s284_s30  ;;  %p286_p3 = pneg %p461_p13 }
  0x16   : > { %s289_s4 = scalar_lea.hbm %s556_s0, 128  ;;  %p290_p5 = scmp.lt.u32.totalorder %s457_s25, %s556_s0 }
  0x17   : > { %p287_p4 = pnand %p286_p3, %p285_p2  ;;  %p291_p8 = scmp.lt.u32.totalorder %s289_s4, %s284_s30 }
  0x18   : > { %p293_p9 = scmp.lt.u32.totalorder %s284_s30, %s457_s25 }
  0x19   : > { %p288_p7 = pneg %p287_p4  ;;  %p292_p10 = por %p291_p8, %p290_p5 }
  0x1b   : > { %p294_p0 = por %p293_p9, %p292_p10 }
  0x1d   : > { %p295_p1 = pnand %p294_p0, %p288_p7 }
  0x1f   : > { %298 = shalt.err (!%p295_p1)
}
  0x20   : > { %s299_s13 = scalar_lea.vmem %s465_s27, 64  ;;  %s382_s14 = smov [#allocation2]  }
  0x21   : > { %p300_p2 = scmp.ne.s32.totalorder %s465_s27, %s299_s13  ;;  %s304_s16 = sshll.u32 %s382_s14, 4  ;;  %s305_s16 = int_to_ptr.vmem [resolvable:$false] %s304_s16 }
  0x22   : > { %s306_s20 = scalar_lea.vmem %s305_s16, 128  ;;  %p307_p11 = scmp.lt.s32.totalorder %s465_s27, %s305_s16 }
  0x23   : > { %p302_p4 = pnand %p300_p2, %p286_p3  ;;  %p308_p5 = scmp.lt.s32.totalorder %s306_s20, %s299_s13 }
  0x25   : > { %p303_p12 = pneg %p302_p4  ;;  %p309_p8 = por %p308_p5, %p307_p11 }
  0x27   : > { %p310_p9 = pnand %p309_p8, %p303_p12 }
  0x29   : > { %313 = shalt.err (!%p310_p9)
}
  0x2a   : > { %245 = dma.hbm_to_vmem [thread:$0]  (!%p461_p13), %s457_s25, 64, %s465_s27, %s88_s29  }
  0x2b   : > { %p564_p0 = scmp.lt.s32.totalorder %s380_s9, 3  ;;  %p565_p1 = scmp.ge.s32.totalorder %s380_s9, 1 }
  0x2d   : > { %p104_p3 = pnand %p565_p1, %p564_p0 }
  0x2e   : > { %s499_s21 = sand.u32 (!%p104_p3), 1, %s372_s7  }
  0x2f   : > { %107 = sbr.rel (%p104_p3) target bundleno = 81 (0x51), region = 24  ;;  %s232_s22 = sshll.u32 (!%p104_p3), %s499_s21, 2 }
  0x30   : > { %s110_s23 = scalar_lea.sflag (!%p104_p3), [#allocation3], %s499_s21  ;;  %s113_s24 = scalar_lea.vmem (!%p104_p3), [#allocation2], %s232_s22 }
  0x36   : > { %359 = dma.done.wait (%p437_p6), %s110_s23, 64  }
  0x37   : > { %361 = vsyncadd (%p437_p6), %s110_s23, 4294967232  ;;  %s233_s25 = sshll.u32 %s499_s21, 3  ;;  %v132_v0 = vld [vmem:[%s113_s24] sm:$0xf]  ;;  %vm136_vm0 = vcmask 1041408   ;;  %s235_s28 = sshll.u32 %s415_s10, 7 }
  0x38   : > { %s131_s26 = scalar_lea.vmem [#allocation5], %s233_s25  ;;  %v134_v1 = vrot.slane %v132_v0, 6  ;;  %vm138_vm1 = vcmask 1045504   ;;  %vm140_vm2 = vcmask 523264   ;;  %s514_s17 = scalar_lea.hbm %s557_s1, %s235_s28 }
  0x39   : > { %s156_s27 = sshll.u32 %s131_s26, 4  ;;  %s143_s2 = scalar_lea.sflag [#allocation4], %s499_s21  ;;  %s509_s27 = int_to_ptr.vmem [resolvable:$true] %s156_s27 }
  0x3a   : > { %v137_v2 = vsel %vm136_vm0, 0.0, %v134_v1  ;;  %s314_s3 = scalar_lea.vmem %s509_s27, 128  ;;  %p566_p11 = scmp.ne.s32.totalorder %s561_s18, 0 }
  0x3b   : > { %v139_v3 = vsel %vm138_vm1, %v137_v2, 0.0  ;;  %p315_p6 = scmp.ne.s32.totalorder %s509_s27, %s314_s3  ;;  %s383_s10 = smov [#allocation5]  }
  0x3c   : > { %141 = vst.msk [vmem:[%s131_s26] sm:$0xff] %vm140_vm2, %v139_v3  ;;  %s318_s4 = sshll.u32 %s383_s10, 4  ;;  %s319_s4 = int_to_ptr.vmem [resolvable:$false] %s318_s4 }
  0x3d   : > { %p316_p12 = pnand %p315_p6, %p566_p11  ;;  %s320_s5 = scalar_lea.vmem %s319_s4, 256 }
  0x3e   : > { %p321_p7 = scmp.lt.s32.totalorder %s509_s27, %s319_s4  ;;  %p322_p10 = scmp.lt.s32.totalorder %s320_s5, %s314_s3 }
  0x3f   : > { %p317_p13 = pneg %p316_p12 }
  0x40   : > { %p323_p2 = por %p322_p10, %p321_p7 }
  0x42   : > { %p324_p4 = pnand %p323_p2, %p317_p13 }
  0x44   : > { %327 = shalt.err (!%p324_p4)
}
  0x45   : > { %s328_s11 = scalar_lea.hbm %s514_s17, 128  ;;  %s332_s16 = scalar_lea.hbm %s557_s1, 256 }
  0x46   : > { %p329_p5 = scmp.ne.s32.totalorder %s514_s17, %s328_s11  ;;  %p333_p0 = scmp.lt.u32.totalorder %s514_s17, %s557_s1 }
  0x47   : > { %p334_p1 = scmp.lt.u32.totalorder %s332_s16, %s328_s11  ;;  %p336_p6 = scmp.lt.u32.totalorder %s328_s11, %s514_s17 }
  0x48   : > { %p330_p8 = pnand %p329_p5, %p566_p11 }
  0x49   : > { %p335_p3 = por %p334_p1, %p333_p0 }
  0x4a   : > { %p331_p9 = pneg %p330_p8 }
  0x4b   : > { %p337_p12 = por %p336_p6, %p335_p3 }
  0x4d   : > { %p338_p13 = pnand %p337_p12, %p331_p9 }
  0x4f   : > { %341 = shalt.err (!%p338_p13)
}
  0x50   : > { %240 = dma.vmem_to_hbm [thread:$0]  (%p566_p11), %s509_s27, 128, %s514_s17, %s143_s2  }
  0x51 PF: > { %s168_s22 = sand.u32 1, %s368_s6   ;;  %p567_p7 = scmp.ne.s32.totalorder %s562_s19, 0 }
  0x52   : > { %p568_p10 = scmp.ge.s32.totalorder %s380_s9, 2  ;;  %s169_s23 = scalar_lea.sflag [#allocation4], %s168_s22 }
  0x54   : > { %p247_p2 = pnand %p568_p10, %p567_p7 }
  0x56   : > { %363 = dma.done.wait (!%p247_p2), %s169_s23, 128  }
  0x57   : > { %365 = vsyncadd (!%p247_p2), %s169_s23, 4294967168  ;;  %p14_p4 = scmp.ge.s32.totalorder %s419_s12, 4   ;;  %s569_s6 = smov %s372_s7 }
  0x58   : > { %s570_s7 = smov %s376_s8  ;;  %s571_s8 = smov %s431_s15 }
  0x59   : > { %s572_s9 = smov %s419_s12  ;;  %16 = sbr.rel (!%p14_p4) target bundleno = 5 (0x5), region = 69 }
  0x60   :  { %174 = vsyncpa [#allocation3], 1 }
  0x61   :  { %176 = vsyncpa [#allocation3 + $0x1], 1 }
  0x62   :  { %177 = vsyncpa [#allocation4], 1 }
  0x63   :  { %179 = vsyncpa [#allocation4 + $0x1], 1 }

</bundles_post_ra>
